<compile_context>
chip_gen: v7x
topology: tpu7x:2x2x1
jax: 0.10.0
libtpu: 0.0.40
codegen_flags: <defaults>
</compile_context>

<pallas_src>
import jax
import jax.numpy as jnp
from jax import lax
from jax.experimental import pallas as pl
from jax.experimental.pallas import tpu as pltpu


def _round_up(x, m):
    return (x + m - 1) // m * m


def _pick_tile_m(M, K8, Cp8, block_m, vmem_budget=20 * 1024 * 1024):
    """Largest lane tile TM (multiple of 128, <= block_m) whose double-buffered working
    set fits the VMEM budget; safe under the 32 MiB scoped default on v5e/v6e and under
    v7x's smaller physical VMEM."""
    tm = max(128, min(_round_up(block_m, 128), _round_up(M, 128)))

    def step_bytes(t):
        # 2x buffered patch tile + 2x buffered out tile + 2x weight + small stats/scale.
        return 2 * (K8 + Cp8) * t * 4 + 2 * Cp8 * K8 * 4 + 8 * Cp8 * 128 * 4

    while tm > 128 and step_bytes(tm) > vmem_budget:
        tm -= 128
    return tm


# --------------------------------------------------------------------------- #
# Pass 1: stats only -- per-channel sum / sum-of-squares of the conv output.
# --------------------------------------------------------------------------- #
def conv_stats_kernel(p_ref, w_ref, sum_ref, sq_ref):
    # p_ref:   (K8, TM)   im2col patch tile (M on lanes)
    # w_ref:   (Cp8, K8)  weight matrix
    # sum_ref: (Cp8, 1)   resident per-channel sum accumulator
    # sq_ref:  (Cp8, 1)   resident per-channel sum-of-squares accumulator
    @pl.when(pl.program_id(0) == 0)
    def _init():
        sum_ref[...] = jnp.zeros_like(sum_ref)
        sq_ref[...] = jnp.zeros_like(sq_ref)

    y = jnp.dot(w_ref[...], p_ref[...], preferred_element_type=jnp.float32)  # (Cp8, TM)
    sum_ref[...] += jnp.sum(y, axis=-1, keepdims=True)
    sq_ref[...] += jnp.sum(y * y, axis=-1, keepdims=True)


# --------------------------------------------------------------------------- #
# Pass 2: recompute the cheap GEMM + per-channel affine (BN) + LeakyReLU(2).
# --------------------------------------------------------------------------- #
def conv_bn_lrelu_kernel(p_ref, w_ref, scale_ref, shift_ref, o_ref):
    y = jnp.dot(w_ref[...], p_ref[...], preferred_element_type=jnp.float32)  # (Cp8, TM)
    z = y * scale_ref[...] + shift_ref[...]
    o_ref[...] = jnp.where(z >= 0.0, z, 2.0 * z)


# --------------------------------------------------------------------------- #
# Wrapper
# --------------------------------------------------------------------------- #
def conv2d_bn_lrelu(x, weight, bias, *, stride, padding, block_m=2048):
    """x: (N, Cin, H, W) NCHW, weight: (Cout, Cin, KH, KW) (already spectral-normalized).
    Returns (N, Cout, OH, OW) = LeakyReLU_2(BatchNorm_train(Conv2d(x)))."""
    del bias  # per-channel constant cancels exactly under training-mode BN (gamma=1, beta=0)
    N, C, H, W = x.shape
    Cout, Cin, KH, KW = weight.shape
    assert C == Cin

    OH = (H + 2 * padding - KH) // stride + 1
    OW = (W + 2 * padding - KW) // stride + 1
    M = N * OH * OW
    K = Cin * KH * KW

    K8 = _round_up(K, 8)        # sublane granularity only; NOT padded to 128
    Cp8 = _round_up(Cout, 8)    # stored channel width at 8-sublane granularity only
    TM = _pick_tile_m(M, K8, Cp8, block_m)
    M_pad = _round_up(M, TM)
    grid_m = M_pad // TM

    # ---- XLA glue: im2col in C-major (K, M) layout, K ordered (kh, kw, cin) ----
    # TODO(synk): build patches in-kernel (pl.ANY HBM x + per-tap double-buffered
    #             make_async_copy gathers) to kill this HBM intermediate entirely.
    x_nhwc = jnp.transpose(x, (0, 2, 3, 1))
    xp = jnp.pad(x_nhwc, ((0, 0), (padding, padding), (padding, padding), (0, 0)))
    taps = []
    for i in range(KH):
        for j in range(KW):
            taps.append(xp[:, i:i + stride * OH:stride, j:j + stride * OW:stride, :])
    patches = jnp.concatenate(taps, axis=-1).reshape(M, K)            # (M, K)
    # Padded rows/cols are exactly zero: padded M columns contribute 0 to the stats
    # (the count below uses the true M) and padded K rows multiply zero weights.
    patches_t = jnp.pad(patches.T, ((0, K8 - K), (0, M_pad - M)))     # (K8, M_pad)

    w_mat = jnp.transpose(weight, (0, 2, 3, 1)).reshape(Cout, K)      # (Cout, K) (kh,kw,cin)
    w_mat = jnp.pad(w_mat, ((0, Cp8 - Cout), (0, K8 - K)))            # (Cp8, K8)

    cparams_acc = pltpu.CompilerParams(
        dimension_semantics=("arbitrary",),       # resident stats accumulator
        vmem_limit_bytes=32 * 1024 * 1024)
    cparams_par = pltpu.CompilerParams(
        dimension_semantics=("parallel",),
        vmem_limit_bytes=32 * 1024 * 1024)

    # ---- pass 1: per-channel sum / sum-of-squares (stats only, no y round trip) ----
    # TODO(synk): v7x megacore -- add a leading core axis with per-core partial stats
    #             summed in the wrapper; single resident accumulator keeps this axis serial.
    ch_sum, ch_sq = pl.pallas_call(
        conv_stats_kernel,
        out_shape=(jax.ShapeDtypeStruct((Cp8, 1), jnp.float32),
                   jax.ShapeDtypeStruct((Cp8, 1), jnp.float32)),
        grid_spec=pltpu.PrefetchScalarGridSpec(
            num_scalar_prefetch=0,
            grid=(grid_m,),
            in_specs=[pl.BlockSpec((K8, TM), lambda i: (0, i)),
                      pl.BlockSpec((Cp8, K8), lambda i: (0, 0))],
            out_specs=(pl.BlockSpec((Cp8, 1), lambda i: (0, 0)),
                       pl.BlockSpec((Cp8, 1), lambda i: (0, 0)))),
        compiler_params=cparams_acc,
    )(patches_t, w_mat)

    # ---- finalize BN scale/shift once per channel (tiny vectors, pure JAX glue) ----
    # TODO(synk): single-pass E[x^2] - mean^2 can cancel when |mean| >> std; switch to a
    #             shifted / second-pass variance if used far outside this regime.
    count = float(M)  # true row count (padded columns are zero and excluded here)
    mean = ch_sum[:, 0] / count
    var = jnp.maximum(ch_sq[:, 0] / count - mean * mean, 0.0)   # biased (training) variance
    inv_std = lax.rsqrt(var + 1e-5)
    scale = inv_std.reshape(Cp8, 1)             # BN gamma = 1 (fresh init)
    shift = (-mean * inv_std).reshape(Cp8, 1)   # BN beta  = 0 (fresh init)

    # ---- pass 2: recompute GEMM + normalize + LeakyReLU(2), parallel over M tiles ----
    out_t = pl.pallas_call(
        conv_bn_lrelu_kernel,
        out_shape=jax.ShapeDtypeStruct((Cp8, M_pad), jnp.float32),
        grid_spec=pltpu.PrefetchScalarGridSpec(
            num_scalar_prefetch=0,
            grid=(grid_m,),
            in_specs=[pl.BlockSpec((K8, TM), lambda i: (0, i)),
                      pl.BlockSpec((Cp8, K8), lambda i: (0, 0)),
                      pl.BlockSpec((Cp8, 1), lambda i: (0, 0)),
                      pl.BlockSpec((Cp8, 1), lambda i: (0, 0))],
            out_specs=pl.BlockSpec((Cp8, TM), lambda i: (0, i))),
        compiler_params=cparams_par,
    )(patches_t, w_mat, scale, shift)

    # ---- glue: drop padding, (Cout, N, OH, OW) -> NCHW ----
    out = out_t[:Cout, :M].reshape(Cout, N, OH, OW).transpose(1, 0, 2, 3)
    return out


# ------------------------- parameter construction ------------------------- #
def spectral_normalize(weight, u, n_power_iterations=1, eps=1e-12):
    """Mimic torch.nn.utils.spectral_norm forward (training): power iteration on
    W viewed as (Cout, Cin*KH*KW), then divide W by sigma."""
    Cout = weight.shape[0]
    w_mat = weight.reshape(Cout, -1)

    def _normalize(v):
        return v / (jnp.linalg.norm(v) + eps)

    v = None
    for _ in range(n_power_iterations):
        v = _normalize(w_mat.T @ u)
        u = _normalize(w_mat @ v)
    sigma = u @ (w_mat @ v)
    return weight / sigma


def _reference(x, w, b, stride, padding):
    """Pure-JAX reference: conv (+bias), training-mode BN, LeakyReLU(2)."""
    y = lax.conv_general_dilated(
        x, w, window_strides=(stride, stride),
        padding=[(padding, padding), (padding, padding)],
        dimension_numbers=("NCHW", "OIHW", "NCHW"))
    y = y + b[None, :, None, None]
    mean = jnp.mean(y, axis=(0, 2, 3), keepdims=True)
    var = jnp.mean((y - mean) ** 2, axis=(0, 2, 3), keepdims=True)
    y = (y - mean) * lax.rsqrt(var + 1e-5)
    return jnp.where(y >= 0.0, y, 2.0 * y)


if __name__ == "__main__":
    # Module config (small, consistent with the PyTorch module's constructor)
    channel_in, channel_out, kernel_size = 4, 8, 3
    N, H, W = 2, 16, 16

    key = jax.random.PRNGKey(0)
    kx, kw, kb, ku = jax.random.split(key, 4)

    x = jax.random.normal(kx, (N, channel_in, H, W), dtype=jnp.float32)

    # conv weight ~ N(0, 0.02) as in torch.nn.init.normal_(conv.weight, 0.0, 0.02)
    w_orig = 0.02 * jax.random.normal(
        kw, (channel_out, channel_in, kernel_size, kernel_size), dtype=jnp.float32)
    # conv bias: PyTorch default uniform(-1/sqrt(fan_in), 1/sqrt(fan_in))
    fan_in = channel_in * kernel_size * kernel_size
    bound = 1.0 / (fan_in ** 0.5)
    bias = jax.random.uniform(kb, (channel_out,), minval=-bound, maxval=bound,
                              dtype=jnp.float32)
    # spectral-norm `u` vector
    u0 = jax.random.normal(ku, (channel_out,), dtype=jnp.float32)
    u0 = u0 / (jnp.linalg.norm(u0) + 1e-12)
    w_sn = spectral_normalize(w_orig, u0, n_power_iterations=1)

    # (stride, padding, block_m): stride=2 exercises the single-tile path with the default
    # large TM; stride=1 with a deliberately small block_m exercises the multi-tile
    # resident-stats accumulation (block_m=128 is for test coverage only).
    configs = [(2, 1, 2048), (1, 1, 128)]
    for stride, padding, block_m in configs:
        out = conv2d_bn_lrelu(x, w_sn, bias, stride=stride, padding=padding,
                              block_m=block_m)
        out = jax.block_until_ready(out)
        ref = _reference(x, w_sn, bias, stride, padding)
        assert out.shape == ref.shape, (out.shape, ref.shape)
        max_err = float(jnp.max(jnp.abs(out - ref)))
        assert jnp.allclose(out, ref, atol=1e-4, rtol=1e-4), (stride, max_err)

    print("KERNEL_OK")
</pallas_src>

<mosaic_0001>
module attributes {stable_mosaic.version = 11 : i64} {
  func.func @conv_stats_kernel(%arg0: i32, %arg1: memref<40x128xf32, #tpu.memory_space<vmem>>, %arg2: memref<8x40xf32, #tpu.memory_space<vmem>>, %arg3: memref<8x1xf32, #tpu.memory_space<vmem>>, %arg4: memref<8x1xf32, #tpu.memory_space<vmem>>) attributes {dimension_semantics = [#tpu.dimension_semantics<arbitrary>], iteration_bounds = array<i64: 1>, scalar_prefetch = 0 : i64, scratch_operands = 0 : i64, tpu.core_type = #tpu.core_type<tc>, window_params = [{transform_indices = @transform_0, window_bounds = array<i64: 40, 128>}, {pipeline_mode = #tpu.pipeline_mode<synchronous>, transform_indices = @transform_1, window_bounds = array<i64: 8, 40>}, {pipeline_mode = #tpu.pipeline_mode<synchronous>, transform_indices = @transform_2, window_bounds = array<i64: 8, 1>}, {pipeline_mode = #tpu.pipeline_mode<synchronous>, transform_indices = @transform_3, window_bounds = array<i64: 8, 1>}]} {
    %c0_i32 = arith.constant 0 : i32
    %0 = arith.cmpi eq, %arg0, %c0_i32 : i32
    %1 = arith.extui %0 : i1 to i32
    %c0_i32_0 = arith.constant 0 : i32
    %2 = arith.cmpi ne, %1, %c0_i32_0 : i32
    scf.if %2 {
      %cst_14 = arith.constant 0.000000e+00 : f32
      %17 = vector.broadcast %cst_14 : f32 to vector<8x1xf32>
      %c0_15 = arith.constant 0 : index
      %c0_16 = arith.constant 0 : index
      %18 = vector.load %arg3[%c0_15, %c0_16] : memref<8x1xf32, #tpu.memory_space<vmem>>, vector<8x1xf32>
      tpu.vector_store %arg3[%c0_15, %c0_16], %17 {strides = array<i32>} : memref<8x1xf32, #tpu.memory_space<vmem>>, vector<8x1xf32>,
      %cst_17 = arith.constant 0.000000e+00 : f32
      %19 = vector.broadcast %cst_17 : f32 to vector<8x1xf32>
      %c0_18 = arith.constant 0 : index
      %c0_19 = arith.constant 0 : index
      %20 = vector.load %arg4[%c0_18, %c0_19] : memref<8x1xf32, #tpu.memory_space<vmem>>, vector<8x1xf32>
      tpu.vector_store %arg4[%c0_18, %c0_19], %19 {strides = array<i32>} : memref<8x1xf32, #tpu.memory_space<vmem>>, vector<8x1xf32>,
    } else {
    }
    %c0 = arith.constant 0 : index
    %c0_1 = arith.constant 0 : index
    %3 = vector.load %arg2[%c0, %c0_1] : memref<8x40xf32, #tpu.memory_space<vmem>>, vector<8x40xf32>
    %c0_2 = arith.constant 0 : index
    %c0_3 = arith.constant 0 : index
    %4 = vector.load %arg1[%c0_2, %c0_3] : memref<40x128xf32, #tpu.memory_space<vmem>>, vector<40x128xf32>
    %cst = arith.constant dense<0.000000e+00> : vector<8x128xf32>
    %5 = tpu.matmul %3, %4, %cst {dimension_numbers = #tpu.dot_dimension_numbers<[1], [0], [0], [1], [0, 0, 1, 1], [], []>} : vector<8x40xf32>, vector<40x128xf32>, vector<8x128xf32> -> vector<8x128xf32>
    %c0_4 = arith.constant 0 : index
    %c0_5 = arith.constant 0 : index
    %6 = vector.load %arg3[%c0_4, %c0_5] : memref<8x1xf32, #tpu.memory_space<vmem>>, vector<8x1xf32>
    %cst_6 = arith.constant dense<0.000000e+00> : vector<8xf32>
    %7 = vector.multi_reduction <add>, %5, %cst_6 [1] : vector<8x128xf32> to vector<8xf32>
    %8 = vector.shape_cast %7 : vector<8xf32> to vector<8x1xf32>
    %9 = arith.addf %6, %8 : vector<8x1xf32>
    %c0_7 = arith.constant 0 : index
    %c0_8 = arith.constant 0 : index
    %10 = vector.load %arg3[%c0_7, %c0_8] : memref<8x1xf32, #tpu.memory_space<vmem>>, vector<8x1xf32>
    tpu.vector_store %arg3[%c0_7, %c0_8], %9 {strides = array<i32>} : memref<8x1xf32, #tpu.memory_space<vmem>>, vector<8x1xf32>,
    %c0_9 = arith.constant 0 : index
    %c0_10 = arith.constant 0 : index
    %11 = vector.load %arg4[%c0_9, %c0_10] : memref<8x1xf32, #tpu.memory_space<vmem>>, vector<8x1xf32>
    %12 = arith.mulf %5, %5 : vector<8x128xf32>
    %cst_11 = arith.constant dense<0.000000e+00> : vector<8xf32>
    %13 = vector.multi_reduction <add>, %12, %cst_11 [1] : vector<8x128xf32> to vector<8xf32>
    %14 = vector.shape_cast %13 : vector<8xf32> to vector<8x1xf32>
    %15 = arith.addf %11, %14 : vector<8x1xf32>
    %c0_12 = arith.constant 0 : index
    %c0_13 = arith.constant 0 : index
    %16 = vector.load %arg4[%c0_12, %c0_13] : memref<8x1xf32, #tpu.memory_space<vmem>>, vector<8x1xf32>
    tpu.vector_store %arg4[%c0_12, %c0_13], %15 {strides = array<i32>} : memref<8x1xf32, #tpu.memory_space<vmem>>, vector<8x1xf32>,
    return
  }
  func.func @transform_0(%arg0: i32) -> (i32, i32) {
    %c0_i32 = arith.constant 0 : i32
    %c0_i32_0 = arith.constant 0 : i32
    return %c0_i32, %arg0 : i32, i32
  }
  func.func @transform_1(%arg0: i32) -> (i32, i32) {
    %c0_i32 = arith.constant 0 : i32
    %c0_i32_0 = arith.constant 0 : i32
    %c0_i32_1 = arith.constant 0 : i32
    return %c0_i32, %c0_i32_0 : i32, i32
  }
  func.func @transform_2(%arg0: i32) -> (i32, i32) {
    %c0_i32 = arith.constant 0 : i32
    %c0_i32_0 = arith.constant 0 : i32
    %c0_i32_1 = arith.constant 0 : i32
    return %c0_i32, %c0_i32_0 : i32, i32
  }
  func.func @transform_3(%arg0: i32) -> (i32, i32) {
    %c0_i32 = arith.constant 0 : i32
    %c0_i32_0 = arith.constant 0 : i32
    %c0_i32_1 = arith.constant 0 : i32
    return %c0_i32, %c0_i32_0 : i32, i32
  }
}

</mosaic_0001>

<bundles_post_ra>
// kernel: tpu_custom_call.1
= control target key start
LH: loop header
LB: loop body
LE: loop exit
PB: predicated region body
PF: predicated region fallthrough
CT: control target
= control target key end

     0   :  { %9 = vsyncpa [#allocation3], 0  ;;  %s302_s0 = inlined_call_operand.hbm [shape: f32[40,128], index: 0, kind: input, shape index: {}]   ;;  %s303_s1 = inlined_call_operand.hbm [shape: f32[8,40], index: 1, kind: input, shape index: {}]   ;;  %s304_s2 = inlined_call_operand.vmem [shape: f32[8,1], index: 2, kind: output, shape index: {0}]   ;;  %s305_s3 = inlined_call_operand.vmem [shape: f32[8,1], index: 3, kind: output, shape index: {1}]  }
   0x1   :  { %10 = vsyncpa [#allocation5], 0  ;;  %s229_s12 = smov [#allocation2]   ;;  %s181_s16 = scalar_lea.hbm %s302_s0, 640 }
   0x2   :  { %s16_s13 = sshll.u32 %s229_s12, 4  ;;  %p182_p0 = scmp.ne.s32.totalorder %s302_s0, %s181_s16  ;;  %s17_s13 = int_to_ptr.vmem [resolvable:$true] %s16_s13 }
   0x3   :  { %p185_p1 = scmp.lt.u32.totalorder %s181_s16, %s302_s0 }
   0x5   :  { %p187_p2 = pnand %p185_p1, %p182_p0 }
   0x7   :  { %190 = shalt.err (!%p187_p2)
}
   0x8   :  { %s191_s21 = scalar_lea.vmem %s17_s13, 640  ;;  %p196_p4 = scmp.lt.s32.totalorder %s17_s13, %s17_s13 }
   0x9   :  { %p192_p3 = scmp.ne.s32.totalorder %s17_s13, %s191_s21  ;;  %p197_p5 = scmp.lt.s32.totalorder %s191_s21, %s191_s21 }
   0xb   :  { %p198_p6 = por %p197_p5, %p196_p4 }
   0xd   :  { %p199_p7 = pnand %p198_p6, %p192_p3 }
   0xf   :  { %202 = shalt.err (!%p199_p7)
}
  0x10   :  { %s230_s22 = smov 128   ;;  %s231_s23 = smov 8  }
  0x11   :  { %22 = dma.hbm_to_vmem [thread:$0]  %s302_s0, 640, %s17_s13, [#allocation3], %s230_s22, %s230_s22, %s231_s23  }
  0x12   :  { %s232_s26 = smov [#allocation4]   ;;  %s203_s30 = scalar_lea.hbm %s303_s1, 128 }
  0x13   :  { %s29_s27 = sshll.u32 %s232_s26, 4  ;;  %p204_p8 = scmp.ne.s32.totalorder %s303_s1, %s203_s30  ;;  %s30_s27 = int_to_ptr.vmem [resolvable:$true] %s29_s27 }
  0x14   :  { %p207_p9 = scmp.lt.u32.totalorder %s203_s30, %s303_s1 }
  0x16   :  { %p209_p10 = pnand %p207_p9, %p204_p8 }
  0x18   :  { %212 = shalt.err (!%p209_p10)
}
  0x19   :  { %s213_s8 = scalar_lea.vmem %s30_s27, 128  ;;  %p218_p12 = scmp.lt.s32.totalorder %s30_s27, %s30_s27 }
  0x1a   :  { %p214_p11 = scmp.ne.s32.totalorder %s30_s27, %s213_s8  ;;  %p219_p13 = scmp.lt.s32.totalorder %s213_s8, %s213_s8 }
  0x1c   :  { %p220_p0 = por %p219_p13, %p218_p12 }
  0x1e   :  { %p221_p1 = pnand %p220_p0, %p214_p11 }
  0x20   :  { %224 = shalt.err (!%p221_p1)
}
  0x21   :  { %32 = dma.hbm_to_vmem [thread:$0]  %s303_s1, 128, %s30_s27, [#allocation5]  }
  0x22   :  { %225 = dma.done.wait [#allocation3], 640  }
  0x23   :  { %226 = vsyncadd [#allocation3], 4294966656 }
  0x24   :  { %227 = dma.done.wait [#allocation5], 128  }
  0x25   :  { %228 = vsyncadd [#allocation5], 4294967168  ;;  %vm43_vm0 = vcmask 7168   ;;  %v233_v0 = vmov 0.0|0.0   ;;  %v234_v1 = vmov 0.0   ;;  %vm235_vm1 = vmmov 0  }
  0x26   :  { %168 = vmatprep.subr.bf16.mxu0 %v233_v0  ;;  %44 = vst.msk [vmem:[%s304_s2] sm:$0xff] %vm43_vm0, %v234_v1  ;;  %45 = vst.msk [vmem:[%s305_s3] sm:$0xff] %vm43_vm0, %v234_v1  ;;  %165 = vmatprep.mubr.msk.f32.mxu0 %vm235_vm1, %v234_v1  ;;  %v47_v2 = vld [vmem:[#allocation2] sm:$0xff]  ;;  %v48_v3 = vld [vmem:[#allocation2 + $0x8] sm:$0xff]  ;;  %vm52_vm2 = vcmask 326656  }
  0x27   :  { %v49_v4 = vld [vmem:[#allocation2 + $0x10] sm:$0xff]  ;;  %v169_v5 = vpack.c.bf16 %v48_v3, %v47_v2  ;;  %v50_v6 = vld [vmem:[#allocation2 + $0x18] sm:$0xff]  ;;  %v51_v8 = vld [vmem:[#allocation2 + $0x20] sm:$0xff] }
  0x28   :  { %v172_v7 = vpack.c.bf16 %v50_v6, %v49_v4  ;;  %v46_v9 = vld [vmem:[#allocation4] sm:$0xff] }
  0x29   :  { %170 = vmatpush3.bf16.msra.mxu0 %v169_v5 }
  0x2a   :  { %171 = vmatprep.subr.bf16.mxu0 %v233_v0 }
  0x2d   :  { %173 = vmatpush3.bf16.msra.mxu0 %v172_v7  ;;  %v126_v13 = vld [vmem:[%s304_s2] sm:$0xff] }
  0x2e   :  { %163 = vmatprep.subr.mxu0 %v234_v1  ;;  %v132_v16 = vld [vmem:[%s305_s3] sm:$0xff] }
  0x31   :  { %164 = vmatpush3.msra.mxu0 %v51_v8 }
  0x32   :  { %166 = vmatmul.mubr.msk.f32.vlgmr.msra.gmra.mrb[0].mxu0 %vm52_vm2, %v46_v9 }
 0x105   :  { %v122_v10 = vpop.f32.mrb[0].mxu0 }
 0x106   :  { %127 = vadd.xlane.f32.xlu0 %v122_v10  ;;  %v167_v11 = vpop.f32.mrb[1].mxu0  ;;  %v133_v12 = vmul.f32 %v122_v10, %v122_v10 }
 0x10a   :  { %134 = vadd.xlane.f32.xlu0 %v133_v12 }
 0x193   :  { %v128_v14 = vpop.xlane.xlu0 %127 }
 0x194   :  { %v129_v15 = vadd.f32 %v128_v14, %v126_v13 }
 0x196   :  { %131 = vst.msk [vmem:[%s304_s2] sm:$0xff] %vm43_vm0, %v129_v15 }
 0x197   :  { %v135_v17 = vpop.xlane.xlu0 %134 }
 0x198   :  { %v136_v18 = vadd.f32 %v135_v17, %v132_v16 }
 0x19a   :  { %137 = vst.msk [vmem:[%s305_s3] sm:$0xff] %vm43_vm0, %v136_v18 }
 0x19b   :  { %146 = vsyncpa [#allocation3], 1 }
 0x19c   :  { %147 = vsyncpa [#allocation5], 1 }

</bundles_post_ra>
